<compile_context>
chip_gen: v7x
topology: tpu7x:2x2x1
jax: 0.10.0
libtpu: 0.0.40
codegen_flags: <defaults>
</compile_context>

<pallas_src>
import functools

import jax
import jax.numpy as jnp
from jax.experimental import pallas as pl
from jax.experimental.pallas import tpu as pltpu


def _brightness_kernel(x_ref, o_ref, *, factor):
    # Purely elementwise: multiply by the brightness factor and clamp to [0, 1].
    y = x_ref[...] * factor
    o_ref[...] = jnp.clip(y, 0.0, 1.0)


def brightness(image: jax.Array, factor: float) -> jax.Array:
    """image: float NCHW (or any shape) array in [0, 1]. Returns same shape/dtype."""
    orig_shape = image.shape
    total = image.size
    dtype = image.dtype
    itemsize = jnp.dtype(dtype).itemsize

    # --- choose a lane-dense 2D layout -------------------------------------
    # Wider last dim => fewer, larger contiguous DMA rows and full-lane stores.
    cols = 128
    for c in (1024, 512, 256):
        if total >= c * 8:
            cols = c
            break

    rows_needed = -(-total // cols)  # ceil division

    # Row tile targeting ~1 MiB per block: big enough to hide per-step overhead
    # (~0.35 us) at HBM bandwidth, small enough that double-buffered in + out
    # (4 x tile) stays far under the scoped VMEM limit on v5e/v6e/v7x.
    tile_r = max(8, ((1 << 20) // (cols * itemsize) // 8) * 8)
    tile_r = min(tile_r, ((rows_needed + 7) // 8) * 8)

    # Pad so rows is an exact multiple of tile_r (every block is full).
    rows = ((rows_needed + tile_r - 1) // tile_r) * tile_r
    padded_total = rows * cols

    flat = image.reshape(-1)
    if padded_total != total:
        flat = jnp.pad(flat, (0, padded_total - total))
    flat = flat.reshape(rows, cols)

    grid = (rows // tile_r,)
    kernel = functools.partial(_brightness_kernel, factor=float(factor))

    out_flat = pl.pallas_call(
        kernel,
        out_shape=jax.ShapeDtypeStruct((rows, cols), dtype),
        grid_spec=pl.GridSpec(
            grid=grid,
            in_specs=[pl.BlockSpec((tile_r, cols), lambda i: (i, 0))],
            out_specs=pl.BlockSpec((tile_r, cols), lambda i: (i, 0)),
        ),
        compiler_params=pltpu.CompilerParams(
            dimension_semantics=("parallel",),  # independent tiles -> v7x 2 TCs
        ),
    )(flat)

    out = out_flat.reshape(-1)
    if padded_total != total:
        out = out[:total]
    return out.reshape(orig_shape)


if __name__ == "__main__":
    key = jax.random.PRNGKey(0)
    k_img, k_img2, k_fac = jax.random.split(key, 3)

    # Deterministic "random" factor as Brightness.get_random_factor would draw
    # (min_factor=0.5, max_factor=1.5), done in plain JAX (glue).
    min_factor, max_factor = 0.5, 1.5
    factor = float(
        jax.random.uniform(k_fac, ()) * (max_factor - min_factor) + min_factor
    )

    # Small NCHW image in [0, 1], as the module expects (128-divisible total).
    x = jax.random.uniform(k_img, (2, 4, 16, 16), dtype=jnp.float32)
    out = jax.block_until_ready(brightness(x, factor))
    ref = jnp.clip(x * factor, 0.0, 1.0)
    assert out.shape == x.shape and out.dtype == x.dtype
    assert jnp.allclose(out, ref, atol=1e-6)

    # Second, non-128-divisible shape to exercise the pad/slice path.
    x2 = jax.random.uniform(k_img2, (1, 3, 17, 19), dtype=jnp.float32)
    out2 = jax.block_until_ready(brightness(x2, factor))
    ref2 = jnp.clip(x2 * factor, 0.0, 1.0)
    assert out2.shape == x2.shape and out2.dtype == x2.dtype
    assert jnp.allclose(out2, ref2, atol=1e-6)

    print("KERNEL_OK")
</pallas_src>

<mosaic_0001>
module attributes {stable_mosaic.version = 11 : i64} {
  func.func @_brightness_kernel(%arg0: i32, %arg1: memref<8x256xf32, #tpu.memory_space<vmem>>, %arg2: memref<8x256xf32, #tpu.memory_space<vmem>>) attributes {dimension_semantics = [#tpu.dimension_semantics<parallel>], iteration_bounds = array<i64: 1>, scalar_prefetch = 0 : i64, scratch_operands = 0 : i64, tpu.core_type = #tpu.core_type<tc>, window_params = [{transform_indices = @transform_0, window_bounds = array<i64: 8, 256>}, {transform_indices = @transform_1, window_bounds = array<i64: 8, 256>}]} {
    %c0 = arith.constant 0 : index
    %c0_0 = arith.constant 0 : index
    %0 = vector.load %arg1[%c0, %c0_0] : memref<8x256xf32, #tpu.memory_space<vmem>>, vector<8x256xf32>
    %cst = arith.constant 1.40244949 : f32
    %1 = vector.broadcast %cst : f32 to vector<8x256xf32>
    %2 = arith.mulf %0, %1 : vector<8x256xf32>
    %cst_1 = arith.constant 0.000000e+00 : f32
    %cst_2 = arith.constant 1.000000e+00 : f32
    %3 = vector.broadcast %cst_1 : f32 to vector<8x256xf32>
    %4 = arith.maximumf %3, %2 : vector<8x256xf32>
    %5 = vector.broadcast %cst_2 : f32 to vector<8x256xf32>
    %6 = arith.minimumf %5, %4 : vector<8x256xf32>
    %c0_3 = arith.constant 0 : index
    %c0_4 = arith.constant 0 : index
    %7 = vector.load %arg2[%c0_3, %c0_4] : memref<8x256xf32, #tpu.memory_space<vmem>>, vector<8x256xf32>
    tpu.vector_store %arg2[%c0_3, %c0_4], %6 {strides = array<i32>} : memref<8x256xf32, #tpu.memory_space<vmem>>, vector<8x256xf32>,
    return
  }
  func.func @transform_0(%arg0: i32) -> (i32, i32) {
    %c0_i32 = arith.constant 0 : i32
    %c0_i32_0 = arith.constant 0 : i32
    return %arg0, %c0_i32 : i32, i32
  }
  func.func @transform_1(%arg0: i32) -> (i32, i32) {
    %c0_i32 = arith.constant 0 : i32
    %c0_i32_0 = arith.constant 0 : i32
    return %arg0, %c0_i32 : i32, i32
  }
}

</mosaic_0001>

<bundles_post_ra>
// kernel: tpu_custom_call.1
= control target key start
LH: loop header
LB: loop body
LE: loop exit
PB: predicated region body
PF: predicated region fallthrough
CT: control target
= control target key end

     0   :  { %6 = vsyncpa [#allocation3], 0  ;;  %s132_s0 = inlined_call_operand.hbm [shape: f32[8,256], index: 0, kind: input, shape index: {}]   ;;  %s133_s1 = inlined_call_operand.hbm [shape: f32[8,256], index: 1, kind: output, shape index: {}]  }
   0x1   :  { %7 = vsyncpa [#allocation4], 0  ;;  %s96_s6 = smov [#allocation2]   ;;  %s48_s10 = scalar_lea.hbm %s132_s0, 256 }
   0x2   :  { %s14_s7 = sshll.u32 %s96_s6, 4  ;;  %p49_p0 = scmp.ne.s32.totalorder %s132_s0, %s48_s10  ;;  %s15_s7 = int_to_ptr.vmem [resolvable:$true] %s14_s7 }
   0x3   :  { %p52_p1 = scmp.lt.u32.totalorder %s48_s10, %s132_s0 }
   0x5   :  { %p54_p2 = pnand %p52_p1, %p49_p0 }
   0x7   :  { %57 = shalt.err (!%p54_p2)
}
   0x8   :  { %s58_s15 = scalar_lea.vmem %s15_s7, 256  ;;  %p63_p4 = scmp.lt.s32.totalorder %s15_s7, %s15_s7 }
   0x9   :  { %p59_p3 = scmp.ne.s32.totalorder %s15_s7, %s58_s15  ;;  %p64_p5 = scmp.lt.s32.totalorder %s58_s15, %s58_s15 }
   0xb   :  { %p65_p6 = por %p64_p5, %p63_p4 }
   0xd   :  { %p66_p7 = pnand %p65_p6, %p59_p3 }
   0xf   :  { %69 = shalt.err (!%p66_p7)
}
  0x10   :  { %17 = dma.hbm_to_vmem [thread:$0]  %s132_s0, 256, %s15_s7, [#allocation3]  }
  0x11   :  { %92 = dma.done.wait [#allocation3], 256  }
  0x12   :  { %93 = vsyncadd [#allocation3], 4294967040  ;;  %v21_v0 = vld [vmem:[#allocation2] sm:$0xff]  ;;  %v22_v1 = vld [vmem:[#allocation2 + $0x8] sm:$0xff]  ;;  %s97_s18 = smov [#allocation5]  }
  0x13   :  { %v23_v2 = vmul.f32 1.4024495, %v21_v0  ;;  %v24_v3 = vmul.f32 1.4024495, %v22_v1  ;;  %s37_s19 = sshll.u32 %s97_s18, 4  ;;  %s38_s19 = int_to_ptr.vmem [resolvable:$true] %s37_s19 }
  0x14   :  { %s70_s20 = scalar_lea.vmem %s38_s19, 256  ;;  %p75_p9 = scmp.lt.s32.totalorder %s38_s19, %s38_s19 }
  0x15   :  { %v25_v4 = vmax.f32 %v23_v2, 0.0  ;;  %v26_v5 = vmax.f32 %v24_v3, 0.0  ;;  %p71_p8 = scmp.ne.s32.totalorder %s38_s19, %s70_s20  ;;  %p76_p10 = scmp.lt.s32.totalorder %s70_s20, %s70_s20 }
  0x17   :  { %v27_v6 = vmin.f32 %v25_v4, 1.0  ;;  %v28_v7 = vmin.f32 %v26_v5, 1.0  ;;  %p77_p11 = por %p76_p10, %p75_p9 }
  0x19   :  { %29 = vst [vmem:[#allocation5] sm:$0xff] %v27_v6  ;;  %30 = vst [vmem:[#allocation5 + $0x8] sm:$0xff] %v28_v7  ;;  %p78_p12 = pnand %p77_p11, %p71_p8 }
  0x1b   :  { %81 = shalt.err (!%p78_p12)
}
  0x1c   :  { %s82_s22 = scalar_lea.hbm %s133_s1, 256 }
  0x1d   :  { %p83_p13 = scmp.ne.s32.totalorder %s133_s1, %s82_s22  ;;  %p86_p0 = scmp.lt.u32.totalorder %s82_s22, %s133_s1 }
  0x1f   :  { %p88_p1 = pnand %p86_p0, %p83_p13 }
  0x21   :  { %91 = shalt.err (!%p88_p1)
}
  0x22   :  { %40 = dma.vmem_to_hbm [thread:$0]  %s38_s19, 256, %s133_s1, [#allocation4]  }
  0x23   :  { %94 = dma.done.wait [#allocation4], 256  }
  0x24   :  { %95 = vsyncadd [#allocation4], 4294967040 }
  0x25   :  { %44 = vsyncpa [#allocation3], 1 }
  0x26   :  { %45 = vsyncpa [#allocation4], 1 }

</bundles_post_ra>
